<compile_context>
chip_gen: v7x
topology: tpu7x:2x2x1
jax: 0.10.0
libtpu: 0.0.40
codegen_flags: <defaults>
</compile_context>

<pallas_src>
import jax
import jax.numpy as jnp
from jax import lax
from jax.experimental import pallas as pl
from jax.experimental.pallas import tpu as pltpu

_LANE = 128      # vreg lane width
_SUBLANE = 8     # vreg sublane count (f32)


def _round_up(x, m):
    return ((x + m - 1) // m) * m


def _linear_kernel(x_ref, w_ref, b_ref, o_ref):
    """Writes the transposed linear output tile: o = w @ x.T + b.

    x_ref: (TM, F_in)        streamed batch tile (F_in on lanes)
    w_ref: (F_out_pad, F_in) PyTorch-layout weight, resident across grid steps
    b_ref: (F_out_pad, 1)    resident bias
    o_ref: (F_out_pad, TM)   batch on the lane axis -> lane-dense stores
    """
    acc = lax.dot_general(
        w_ref[...], x_ref[...],
        dimension_numbers=(((1,), (1,)), ((), ())),   # contract on F_in
        preferred_element_type=jnp.float32)           # MXU, f32 accumulation
    o_ref[...] = (acc + b_ref[...]).astype(o_ref.dtype)


def prepare_lazy_linear_params(weight, bias):
    """One-time (init-time) param prep, hoisted out of the forward path.

    weight: (F_out, F_in) PyTorch layout; bias: (F_out,).
    Only pads F_out (5) up to the 8-row sublane granule -- no transpose.
    """
    f_out, f_in = weight.shape
    f_out_pad = _round_up(f_out, _SUBLANE)
    w_p = jnp.pad(weight, ((0, f_out_pad - f_out), (0, 0)))            # (8, F_in)
    b_p = jnp.pad(bias, (0, f_out_pad - f_out)).reshape(f_out_pad, 1)  # (8, 1)
    return w_p, b_p, f_out


def lazy_network_forward(x, w_p, b_p, f_out, *, tm_max=1024,
                         min_pallas_batch=512,
                         vmem_budget_bytes=24 << 20):
    """y = x @ weight.T + bias (materialized nn.LazyLinear forward).

    x: (B, F_in) float32; w_p/b_p/f_out from prepare_lazy_linear_params.
    Returns (B, F_out).
    """
    B, f_in = x.shape
    f_out_pad = w_p.shape[0]

    # Tiny batches: pallas_call fixed cost + pad/slice launches dominate;
    # let XLA fuse the plain matmul instead.
    if B < min_pallas_batch:
        return x @ w_p[:f_out].T + b_p[:f_out, 0]

    # --- batch tiling --------------------------------------------------------
    # VMEM cap: double-buffered x tile + double-buffered (transposed) out tile
    # must fit the scoped budget (keeps v7x's smaller 64 MiB VMEM safe when
    # F_in is wide).
    bytes_per_row = 2 * f_in * x.dtype.itemsize + 2 * f_out_pad * 4
    tm_cap = max(_LANE, (vmem_budget_bytes // bytes_per_row) // _LANE * _LANE)
    tm = min(tm_max, tm_cap)

    n_tiles = pl.cdiv(B, tm)
    # v7x has 2 TensorCores: ensure the "parallel" batch axis has >=2 tiles
    # whenever the batch is big enough to split (harmless on v5e/v6e).
    if n_tiles == 1 and B >= 2 * _LANE:
        n_tiles = 2
    # Balanced tiles (avoids up to TM-1 rows of over-padding on awkward B),
    # rounded to 128 so the batch dim stays lane-dense in the output store.
    TM = _round_up(pl.cdiv(B, n_tiles), _LANE)
    B_pad = n_tiles * TM

    x_p = x if B_pad == B else jnp.pad(x, ((0, B_pad - B), (0, 0)))

    # NOTE: weight/bias blocks are tiny here (f_out_pad x f_in); for very wide
    # F_in one would add pipeline_mode=pl.Buffered(1) on the constant-index
    # weight/bias specs (and/or a K grid axis with a VMEM accumulator) to keep
    # VMEM in check on v7x. Not needed at these sizes.
    y_t = pl.pallas_call(
        _linear_kernel,
        out_shape=jax.ShapeDtypeStruct((f_out_pad, B_pad), x.dtype),
        grid=(n_tiles,),
        in_specs=[
            pl.BlockSpec((TM, f_in), lambda i: (i, 0)),         # streamed x
            pl.BlockSpec((f_out_pad, f_in), lambda i: (0, 0)),  # resident W
            pl.BlockSpec((f_out_pad, 1), lambda i: (0, 0)),     # resident b
        ],
        out_specs=pl.BlockSpec((f_out_pad, TM), lambda i: (0, i)),
        compiler_params=pltpu.CompilerParams(
            dimension_semantics=("parallel",)),
    )(x_p, w_p, b_p)

    # (f_out_pad, B_pad) -> (B, F_out). Padded batch lanes hold bias values
    # (not zeros) but are sliced away here; the slab is only 8 rows wide.
    return y_t[:f_out, :B].T


if __name__ == "__main__":
    key = jax.random.PRNGKey(0)
    kx, kw, kb, kx2 = jax.random.split(key, 4)

    in_features, out_features = 32, 5
    batch = 1024   # large enough to take the Pallas path (2 grid tiles)

    # Deterministic params (LazyLinear materializes (out, in) weight + bias
    # on first forward).
    bound = 1.0 / jnp.sqrt(in_features)
    weight = jax.random.uniform(kw, (out_features, in_features),
                                minval=-bound, maxval=bound, dtype=jnp.float32)
    bias = jax.random.uniform(kb, (out_features,),
                              minval=-bound, maxval=bound, dtype=jnp.float32)

    # One-time param prep, hoisted out of the forward path.
    w_p, b_p, f_out = prepare_lazy_linear_params(weight, bias)

    # Pallas path.
    x = jax.random.normal(kx, (batch, in_features), dtype=jnp.float32)
    y = lazy_network_forward(x, w_p, b_p, f_out)
    jax.block_until_ready(y)
    y_ref = x @ weight.T + bias
    assert y.shape == (batch, out_features)
    assert jnp.allclose(y, y_ref, atol=1e-5, rtol=1e-5)

    # Tiny-batch path (falls back to the fused XLA linear).
    x_small = jax.random.normal(kx2, (8, in_features), dtype=jnp.float32)
    y_small = lazy_network_forward(x_small, w_p, b_p, f_out)
    jax.block_until_ready(y_small)
    assert jnp.allclose(y_small, x_small @ weight.T + bias, atol=1e-5, rtol=1e-5)

    print("KERNEL_OK")
</pallas_src>

<mosaic_0001>
module attributes {stable_mosaic.version = 11 : i64} {
  func.func @_linear_kernel(%arg0: i32, %arg1: memref<512x32xf32, #tpu.memory_space<vmem>>, %arg2: memref<8x32xf32, #tpu.memory_space<vmem>>, %arg3: memref<8x1xf32, #tpu.memory_space<vmem>>, %arg4: memref<8x512xf32, #tpu.memory_space<vmem>>) attributes {dimension_semantics = [#tpu.dimension_semantics<parallel>], iteration_bounds = array<i64: 2>, scalar_prefetch = 0 : i64, scratch_operands = 0 : i64, tpu.core_type = #tpu.core_type<tc>, window_params = [{transform_indices = @transform_0, window_bounds = array<i64: 512, 32>}, {pipeline_mode = #tpu.pipeline_mode<synchronous>, transform_indices = @transform_1, window_bounds = array<i64: 8, 32>}, {pipeline_mode = #tpu.pipeline_mode<synchronous>, transform_indices = @transform_2, window_bounds = array<i64: 8, 1>}, {transform_indices = @transform_3, window_bounds = array<i64: 8, 512>}]} {
    %c0 = arith.constant 0 : index
    %c0_0 = arith.constant 0 : index
    %0 = vector.load %arg2[%c0, %c0_0] : memref<8x32xf32, #tpu.memory_space<vmem>>, vector<8x32xf32>
    %c0_1 = arith.constant 0 : index
    %c0_2 = arith.constant 0 : index
    %1 = vector.load %arg1[%c0_1, %c0_2] : memref<512x32xf32, #tpu.memory_space<vmem>>, vector<512x32xf32>
    %cst = arith.constant dense<0.000000e+00> : vector<8x512xf32>
    %2 = tpu.matmul %0, %1, %cst {dimension_numbers = #tpu.dot_dimension_numbers<[1], [1], [0], [0], [0, 0, 1, 0], [], []>} : vector<8x32xf32>, vector<512x32xf32>, vector<8x512xf32> -> vector<8x512xf32>
    %c0_3 = arith.constant 0 : index
    %c0_4 = arith.constant 0 : index
    %3 = vector.load %arg3[%c0_3, %c0_4] : memref<8x1xf32, #tpu.memory_space<vmem>>, vector<8x1xf32>
    %4 = vector.broadcast %3 : vector<8x1xf32> to vector<8x512xf32>
    %5 = arith.addf %2, %4 : vector<8x512xf32>
    %c0_5 = arith.constant 0 : index
    %c0_6 = arith.constant 0 : index
    %6 = vector.load %arg4[%c0_5, %c0_6] : memref<8x512xf32, #tpu.memory_space<vmem>>, vector<8x512xf32>
    tpu.vector_store %arg4[%c0_5, %c0_6], %5 {strides = array<i32>} : memref<8x512xf32, #tpu.memory_space<vmem>>, vector<8x512xf32>,
    return
  }
  func.func @transform_0(%arg0: i32) -> (i32, i32) {
    %c0_i32 = arith.constant 0 : i32
    %c0_i32_0 = arith.constant 0 : i32
    return %arg0, %c0_i32 : i32, i32
  }
  func.func @transform_1(%arg0: i32) -> (i32, i32) {
    %c0_i32 = arith.constant 0 : i32
    %c0_i32_0 = arith.constant 0 : i32
    %c0_i32_1 = arith.constant 0 : i32
    return %c0_i32, %c0_i32_0 : i32, i32
  }
  func.func @transform_2(%arg0: i32) -> (i32, i32) {
    %c0_i32 = arith.constant 0 : i32
    %c0_i32_0 = arith.constant 0 : i32
    %c0_i32_1 = arith.constant 0 : i32
    return %c0_i32, %c0_i32_0 : i32, i32
  }
  func.func @transform_3(%arg0: i32) -> (i32, i32) {
    %c0_i32 = arith.constant 0 : i32
    %c0_i32_0 = arith.constant 0 : i32
    return %c0_i32, %arg0 : i32, i32
  }
}

</mosaic_0001>

<bundles_post_ra>
// kernel: tpu_custom_call.1
= control target key start
LH: loop header
LB: loop body
LE: loop exit
PB: predicated region body
PF: predicated region fallthrough
CT: control target
= control target key end

     0   :  { %8 = vsyncpa [#allocation3], 0  ;;  %s1280_s0 = inlined_call_operand.vmem [shape: f32[1024,32], index: 0, kind: input, shape index: {}]   ;;  %s1281_s1 = inlined_call_operand.vmem [shape: f32[8,32], index: 1, kind: input, shape index: {}]   ;;  %s1282_s2 = inlined_call_operand.vmem [shape: f32[8,1], index: 2, kind: input, shape index: {}]   ;;  %s1283_s3 = inlined_call_operand.hbm [shape: f32[8,1024], index: 3, kind: output, shape index: {}]  }
   0x1   :  { %10 = vsyncpa [#allocation3 + $0x1], 0  ;;  %s1029_s12 = smov 0   ;;  %s1031_s13 = smov 0  }
   0x2   :  { %s1033_s14 = smov 0   ;;  %s1035_s15 = smov 0  }
   0x3 LB: > { %s1050_s16 = sadd.s32 4294967295, %s1005_s15   ;;  %s659_s17 = sadd.s32 4294967294, %s1005_s15   ;;  %s1005_s15 = sphi %s1035_s15, %s1291_s15   ;;  %s1001_s14 = sphi %s1033_s14, %s1290_s14   ;;  %s997_s13 = sphi %s1031_s13, %s1289_s13   ;;  %s993_s12 = sphi %s1029_s12, %s1288_s12  }
   0x4   : > { %s1054_s18 = sadd.s32 1, %s1005_s15   ;;  %s91_s19 = sadd.s32 1, %s1001_s14 }
   0x5   : > { %s88_s20 = ssub.s32 %s1005_s15, %s1054_s18  ;;  %p101_p0 = scmp.ne.s32.totalorder %s1001_s14, %s997_s13 }
   0x6   : > { %p89_p1 = scmp.eq.s32.totalorder %s88_s20, 0  ;;  %p102_p2 = scmp.eq.s32.totalorder %s1050_s16, 1 }
   0x7   : > { %p107_p3 = scmp.ne.s32.totalorder %s997_s13, %s993_s12  ;;  %p108_p4 = scmp.eq.s32.totalorder %s659_s17, 1 }
   0x8   : > { %s1065_s21 = scalar_select %p89_p1, %s1001_s14, %s91_s19  }
   0x9   : > { %p1067_p5 = por %p102_p2, %p101_p0  ;;  %p1071_p6 = por %p108_p4, %p107_p3 }
   0xa   : > { %p662_p7 = scmp.ge.s32.totalorder %s1005_s15, 1  ;;  %p141_p8 = scmp.lt.s32.totalorder %s1005_s15, 3 }
   0xc   : > { %p142_p9 = pnand %p662_p7, %p141_p8 }
   0xd   : > { %s664_s24 = sshll.u32 (!%p142_p9), %s1050_s16, 6  ;;  %vm243_vm0 = vcmask (!%p142_p9), 261120   ;;  %v1081_v0 = vld [vmem:[%s1281_s1] sm:$0xff] (!%p142_p9)  ;;  %v1007_v2 = vmov (!%p142_p9), 0   ;;  %s162_s6 = sand.u32 (!%p142_p9), 1, %s997_s13  }
   0xe   : > { %145 = sbr.rel (%p142_p9) target bundleno = 322 (0x142), region = 32  ;;  %v237_v1 = vld [vmem:[%s1282_s2] sm:$0xff] (!%p142_p9)  ;;  %p166_p10 = scmp.lt.s32.totalorder (!%p142_p9), %s664_s24, 127  ;;  %770 = vmatprep.mubr.msk.f32.mxu0 (!%p142_p9), %vm243_vm0, %v1081_v0  ;;  %804 = vmatprep.mubr.msk.f32.mxu1 (!%p142_p9), %vm243_vm0, %v1081_v0  ;;  %vm1097_vm1 = vmpackc.low (!%p142_p9), %vm243_vm0, %vm243_vm0 }
   0xf   : > { %942 = vset.pattern.permute.xlu0 (!%p142_p9), %v1007_v2  ;;  %s663_s7 = sshll.u32 (!%p142_p9), %s162_s6, 5  ;;  %s737_s8 = sshll.u32 (!%p142_p9), %s1050_s16, 9 }
  0x10   : > { %240 = vperm.xlu0 (!%p142_p9), %942, %v237_v1   ;;  %s164_s9 = scalar_lea.vmem (!%p142_p9), [#allocation2], %s663_s7  ;;  %s1238_s19 = scalar_lea.hbm (!%p142_p9), %s1283_s3, %s737_s8 }
  0x11   : > { %s600_s10 = sshll.u32 (!%p142_p9), %s164_s9, 4  ;;  %s586_s16 = scalar_lea.sflag (!%p142_p9), [#allocation3], %s162_s6  ;;  %s1240_s10 = int_to_ptr.vmem [resolvable:$true] %s600_s10 }
  0x12   : > { %s943_s20 = scalar_lea.vmem (!%p142_p9), %s1240_s10, 512 }
  0x13   : > { %p944_p11 = scmp.ne.s32.totalorder (!%p142_p9), %s1240_s10, %s943_s20 }
  0x15   : > { %s1293_s24 = smov (!%p166_p10, %s664_s24), 127  ;;  %p945_p12 = pnand %p944_p11, %p1067_p5 }
  0x16   : > { %s665_s29 = sshll.u32 %s1293_s24, 3  ;;  %s1008_s24 = smov [#allocation2]  }
  0x17   : > { %s1093_s5 = scalar_lea.vmem %s1280_s0, %s665_s29  ;;  %p946_p13 = pneg %p945_p12 }
  0x18   : > { %v189_v4 = vld [vmem:[%s1093_s5 + $0x80] sm:$0xff]  ;;  %v190_v5 = vld [vmem:[%s1093_s5 + $0x88] sm:$0xff]  ;;  %v191_v15 = vld [vmem:[%s1093_s5 + $0x90] sm:$0xff]  ;;  %s947_s25 = sshll.u32 %s1008_s24, 4  ;;  %s948_s25 = int_to_ptr.vmem [resolvable:$false] %s947_s25 }
  0x19   : > { %v221_v6 = vld [vmem:[%s1093_s5 + $0x180] sm:$0xff]  ;;  %v806_v7 = vpack.c.bf16 %v190_v5, %v189_v4  ;;  %v222_v8 = vld [vmem:[%s1093_s5 + $0x188] sm:$0xff]  ;;  %v192_v17 = vld [vmem:[%s1093_s5 + $0x98] sm:$0xff]  ;;  %s949_s26 = scalar_lea.vmem %s948_s25, 1024  ;;  %p950_p0 = scmp.lt.s32.totalorder %s1240_s10, %s948_s25 }
  0x1a   : > { %v173_v9 = vld [vmem:[%s1093_s5] sm:$0xff]  ;;  %v174_v10 = vld [vmem:[%s1093_s5 + $0x8] sm:$0xff]  ;;  %v854_v11 = vpack.c.bf16 %v222_v8, %v221_v6  ;;  %v223_v18 = vld [vmem:[%s1093_s5 + $0x190] sm:$0xff]  ;;  %v812_v20 = vpack.c.bf16 %v192_v17, %v191_v15  ;;  %p951_p1 = scmp.lt.s32.totalorder %s949_s26, %s943_s20 }
  0x1b   : > { %v809_v12 = vpack.c.bf16 %v174_v10, %v173_v9  ;;  %v205_v13 = vld [vmem:[%s1093_s5 + $0x100] sm:$0xff]  ;;  %v206_v14 = vld [vmem:[%s1093_s5 + $0x108] sm:$0xff]  ;;  %808 = vmatprep.subr.msk.bf16.mxu0 %vm1097_vm1, %v806_v7  ;;  %v224_v19 = vld [vmem:[%s1093_s5 + $0x198] sm:$0xff] }
  0x1c   : > { %v857_v16 = vpack.c.bf16 %v206_v14, %v205_v13  ;;  %856 = vmatprep.subr.msk.bf16.mxu1 %vm1097_vm1, %v854_v11  ;;  %v860_v21 = vpack.c.bf16 %v224_v19, %v223_v18  ;;  %v175_v22 = vld [vmem:[%s1093_s5 + $0x10] sm:$0xff]  ;;  %v176_v23 = vld [vmem:[%s1093_s5 + $0x18] sm:$0xff]  ;;  %v193_v26 = vld [vmem:[%s1093_s5 + $0xa0] sm:$0xff]  ;;  %p952_p2 = por %p951_p1, %p950_p0 }
  0x1d   : > { %811 = vmatpush3.bf16.xpose.msk.msra.mxu0 %vm1097_vm1, %v809_v12  ;;  %v207_v24 = vld [vmem:[%s1093_s5 + $0x110] sm:$0xff]  ;;  %v208_v25 = vld [vmem:[%s1093_s5 + $0x118] sm:$0xff]  ;;  %v194_v27 = vld [vmem:[%s1093_s5 + $0xa8] sm:$0xff]  ;;  %v815_v30 = vpack.c.bf16 %v176_v23, %v175_v22 }
  0x1e   : > { %859 = vmatpush3.bf16.xpose.msk.msra.mxu1 %vm1097_vm1, %v857_v16  ;;  %814 = vmatprep.subr.msk.bf16.mxu0 %vm1097_vm1, %v812_v20  ;;  %v225_v28 = vld [vmem:[%s1093_s5 + $0x1a0] sm:$0xff]  ;;  %v226_v29 = vld [vmem:[%s1093_s5 + $0x1a8] sm:$0xff]  ;;  %v863_v31 = vpack.c.bf16 %v208_v25, %v207_v24  ;;  %v818_v32 = vpack.c.bf16 %v194_v27, %v193_v26  ;;  %v195_v38 = vld [vmem:[%s1093_s5 + $0xb0] sm:$0xff]  ;;  %p953_p3 = pnand %p952_p2, %p946_p13 }
  0x1f   : > { %862 = vmatprep.subr.msk.bf16.mxu1 %vm1097_vm1, %v860_v21  ;;  %v866_v33 = vpack.c.bf16 %v226_v29, %v225_v28  ;;  %v177_v34 = vld [vmem:[%s1093_s5 + $0x20] sm:$0xff]  ;;  %v178_v35 = vld [vmem:[%s1093_s5 + $0x28] sm:$0xff]  ;;  %v196_v39 = vld [vmem:[%s1093_s5 + $0xb8] sm:$0xff] }
  0x20   : > { %v209_v36 = vld [vmem:[%s1093_s5 + $0x120] sm:$0xff]  ;;  %v210_v37 = vld [vmem:[%s1093_s5 + $0x128] sm:$0xff]  ;;  %v227_v40 = vld [vmem:[%s1093_s5 + $0x1b0] sm:$0xff]  ;;  %v821_v42 = vpack.c.bf16 %v178_v35, %v177_v34  ;;  %v824_v44 = vpack.c.bf16 %v196_v39, %v195_v38 }
  0x21   : > { %v228_v41 = vld [vmem:[%s1093_s5 + $0x1b8] sm:$0xff]  ;;  %v869_v43 = vpack.c.bf16 %v210_v37, %v209_v36  ;;  %v179_v46 = vld [vmem:[%s1093_s5 + $0x30] sm:$0xff]  ;;  %v197_v50 = vld [vmem:[%s1093_s5 + $0xc0] sm:$0xff] }
  0x22   : > { %v872_v45 = vpack.c.bf16 %v228_v41, %v227_v40  ;;  %v180_v47 = vld [vmem:[%s1093_s5 + $0x38] sm:$0xff]  ;;  %v211_v48 = vld [vmem:[%s1093_s5 + $0x130] sm:$0xff]  ;;  %v198_v51 = vld [vmem:[%s1093_s5 + $0xc8] sm:$0xff] }
  0x23   : > { %v212_v49 = vld [vmem:[%s1093_s5 + $0x138] sm:$0xff]  ;;  %v229_v52 = vld [vmem:[%s1093_s5 + $0x1c0] sm:$0xff]  ;;  %v230_v53 = vld [vmem:[%s1093_s5 + $0x1c8] sm:$0xff]  ;;  %v827_v54 = vpack.c.bf16 %v180_v47, %v179_v46  ;;  %v830_v56 = vpack.c.bf16 %v198_v51, %v197_v50 }
  0x24   : > { %v875_v55 = vpack.c.bf16 %v212_v49, %v211_v48  ;;  %v878_v57 = vpack.c.bf16 %v230_v53, %v229_v52  ;;  %v181_v58 = vld [vmem:[%s1093_s5 + $0x40] sm:$0xff]  ;;  %v182_v59 = vld [vmem:[%s1093_s5 + $0x48] sm:$0xff]  ;;  %v199_v62 = vld [vmem:[%s1093_s5 + $0xd0] sm:$0xff] }
  0x25   : > { %817 = vmatpush3.bf16.xpose.msk.msra.mxu0 %vm1097_vm1, %v815_v30  ;;  %v213_v60 = vld [vmem:[%s1093_s5 + $0x140] sm:$0xff]  ;;  %v214_v61 = vld [vmem:[%s1093_s5 + $0x148] sm:$0xff]  ;;  %v200_v63 = vld [vmem:[%s1093_s5 + $0xd8] sm:$0xff]  ;;  %v833_v4 = vpack.c.bf16 %v182_v59, %v181_v58 }
  0x26   : > { %865 = vmatpush3.bf16.xpose.msk.msra.mxu1 %vm1097_vm1, %v863_v31  ;;  %820 = vmatprep.subr.msk.bf16.mxu0 %vm1097_vm1, %v818_v32  ;;  %v231_v1 = vld [vmem:[%s1093_s5 + $0x1d0] sm:$0xff]  ;;  %v232_v2 = vld [vmem:[%s1093_s5 + $0x1d8] sm:$0xff]  ;;  %v881_v5 = vpack.c.bf16 %v214_v61, %v213_v60  ;;  %v836_v6 = vpack.c.bf16 %v200_v63, %v199_v62  ;;  %v201_v12 = vld [vmem:[%s1093_s5 + $0xe0] sm:$0xff] }
  0x27   : > { %868 = vmatprep.subr.msk.bf16.mxu1 %vm1097_vm1, %v866_v33  ;;  %v884_v7 = vpack.c.bf16 %v232_v2, %v231_v1  ;;  %v183_v8 = vld [vmem:[%s1093_s5 + $0x50] sm:$0xff]  ;;  %v184_v9 = vld [vmem:[%s1093_s5 + $0x58] sm:$0xff]  ;;  %v202_v13 = vld [vmem:[%s1093_s5 + $0xe8] sm:$0xff] }
  0x28   : > { %v215_v10 = vld [vmem:[%s1093_s5 + $0x150] sm:$0xff]  ;;  %v216_v11 = vld [vmem:[%s1093_s5 + $0x158] sm:$0xff]  ;;  %v233_v14 = vld [vmem:[%s1093_s5 + $0x1e0] sm:$0xff]  ;;  %v839_v16 = vpack.c.bf16 %v184_v9, %v183_v8  ;;  %v842_v18 = vpack.c.bf16 %v202_v13, %v201_v12 }
  0x29   : > { %v234_v15 = vld [vmem:[%s1093_s5 + $0x1e8] sm:$0xff]  ;;  %v887_v17 = vpack.c.bf16 %v216_v11, %v215_v10  ;;  %v185_v20 = vld [vmem:[%s1093_s5 + $0x60] sm:$0xff]  ;;  %v203_v24 = vld [vmem:[%s1093_s5 + $0xf0] sm:$0xff] }
  0x2a   : > { %v890_v19 = vpack.c.bf16 %v234_v15, %v233_v14  ;;  %v186_v21 = vld [vmem:[%s1093_s5 + $0x68] sm:$0xff]  ;;  %v217_v22 = vld [vmem:[%s1093_s5 + $0x160] sm:$0xff]  ;;  %v204_v25 = vld [vmem:[%s1093_s5 + $0xf8] sm:$0xff] }
  0x2b   : > { %v218_v23 = vld [vmem:[%s1093_s5 + $0x168] sm:$0xff]  ;;  %v235_v26 = vld [vmem:[%s1093_s5 + $0x1f0] sm:$0xff]  ;;  %v236_v27 = vld [vmem:[%s1093_s5 + $0x1f8] sm:$0xff]  ;;  %v845_v28 = vpack.c.bf16 %v186_v21, %v185_v20  ;;  %v848_v30 = vpack.c.bf16 %v204_v25, %v203_v24 }
  0x2c   : > { %v893_v29 = vpack.c.bf16 %v218_v23, %v217_v22  ;;  %v896_v31 = vpack.c.bf16 %v236_v27, %v235_v26  ;;  %v187_v32 = vld [vmem:[%s1093_s5 + $0x70] sm:$0xff]  ;;  %v188_v33 = vld [vmem:[%s1093_s5 + $0x78] sm:$0xff] }
  0x2d   : > { %823 = vmatpush3.bf16.xpose.msk.msra.mxu0 %vm1097_vm1, %v821_v42  ;;  %v219_v34 = vld [vmem:[%s1093_s5 + $0x170] sm:$0xff]  ;;  %v220_v35 = vld [vmem:[%s1093_s5 + $0x178] sm:$0xff]  ;;  %v851_v36 = vpack.c.bf16 %v188_v33, %v187_v32 }
  0x2e   : > { %871 = vmatpush3.bf16.xpose.msk.msra.mxu1 %vm1097_vm1, %v869_v43  ;;  %826 = vmatprep.subr.msk.bf16.mxu0 %vm1097_vm1, %v824_v44  ;;  %v899_v37 = vpack.c.bf16 %v220_v35, %v219_v34 }
  0x2f   : > { %874 = vmatprep.subr.msk.bf16.mxu1 %vm1097_vm1, %v872_v45 }
  0x35   : > { %829 = vmatpush3.bf16.xpose.msk.msra.mxu0 %vm1097_vm1, %v827_v54 }
  0x36   : > { %877 = vmatpush3.bf16.xpose.msk.msra.mxu1 %vm1097_vm1, %v875_v55  ;;  %832 = vmatprep.subr.msk.bf16.mxu0 %vm1097_vm1, %v830_v56 }
  0x37   : > { %880 = vmatprep.subr.msk.bf16.mxu1 %vm1097_vm1, %v878_v57 }
  0x3d   : > { %835 = vmatpush3.bf16.xpose.msk.msra.mxu0 %vm1097_vm1, %v833_v4 }
  0x3e   : > { %883 = vmatpush3.bf16.xpose.msk.msra.mxu1 %vm1097_vm1, %v881_v5  ;;  %838 = vmatprep.subr.msk.bf16.mxu0 %vm1097_vm1, %v836_v6 }
  0x3f   : > { %886 = vmatprep.subr.msk.bf16.mxu1 %vm1097_vm1, %v884_v7 }
  0x45   : > { %841 = vmatpush3.bf16.xpose.msk.msra.mxu0 %vm1097_vm1, %v839_v16 }
  0x46   : > { %889 = vmatpush3.bf16.xpose.msk.msra.mxu1 %vm1097_vm1, %v887_v17  ;;  %844 = vmatprep.subr.msk.bf16.mxu0 %vm1097_vm1, %v842_v18 }
  0x47   : > { %892 = vmatprep.subr.msk.bf16.mxu1 %vm1097_vm1, %v890_v19 }
  0x4d   : > { %847 = vmatpush3.bf16.xpose.msk.msra.mxu0 %vm1097_vm1, %v845_v28 }
  0x4e   : > { %895 = vmatpush3.bf16.xpose.msk.msra.mxu1 %vm1097_vm1, %v893_v29  ;;  %850 = vmatprep.subr.msk.bf16.mxu0 %vm1097_vm1, %v848_v30 }
  0x4f   : > { %898 = vmatprep.subr.msk.bf16.mxu1 %vm1097_vm1, %v896_v31 }
  0x55   : > { %853 = vmatpush3.bf16.xpose.msk.msra.mxu0 %vm1097_vm1, %v851_v36 }
  0x56   : > { %901 = vmatpush3.bf16.xpose.msk.msra.mxu1 %vm1097_vm1, %v899_v37 }
  0x5c   : > { %771 = vmatmul.mubr.msk.f32.vlgmr.msra.gmra.mrb[0].mxu0 %vm243_vm0, %v1081_v0 }
  0x5d   : > { %805 = vmatmul.mubr.msk.f32.vlgmr.msra.gmra.mrb[0].mxu1 %vm243_vm0, %v1081_v0 }
  0x8f   : > { %v241_v38 = vpop.permute.xlu0 %240 }
 0x12f   : > { %v505_v39 = vpop.f32.mrb[0].mxu0 }
 0x130   : > { %v506_v40 = vadd.f32 %v505_v39, %v241_v38  ;;  %v576_v41 = vpop.f32.mrb[0].mxu1  ;;  %v507_v42 = vpop.f32.mrb[1].mxu0 }
 0x131   : > { %v577_v43 = vadd.f32 %v576_v41, %v241_v38  ;;  %v508_v3 = vadd.f32 %v507_v42, %v241_v38  ;;  %v578_v44 = vpop.f32.mrb[1].mxu1 }
 0x132   : > { %581 = vst [vmem:[%s164_s9] sm:$0xff] %v506_v40  ;;  %v579_v45 = vadd.f32 %v578_v44, %v241_v38 }
 0x133   : > { %583 = vst [vmem:[%s164_s9 + $0x10] sm:$0xff] %v577_v43  ;;  %582 = vst [vmem:[%s164_s9 + $0x8] sm:$0xff] %v508_v3 }
 0x134   : > { %584 = vst [vmem:[%s164_s9 + $0x18] sm:$0xff] %v579_v45 }
 0x135   : > { %956 = shalt.err (!%p953_p3)
}
 0x136   : > { %s957_s27 = scalar_lea.hbm %s1238_s19, 512  ;;  %s961_s30 = scalar_lea.hbm %s1283_s3, 1024 }
 0x137   : > { %p958_p4 = scmp.ne.s32.totalorder %s1238_s19, %s957_s27  ;;  %p962_p9 = scmp.lt.u32.totalorder %s1238_s19, %s1283_s3 }
 0x138   : > { %p963_p10 = scmp.lt.u32.totalorder %s961_s30, %s957_s27  ;;  %p965_p12 = scmp.lt.u32.totalorder %s957_s27, %s1238_s19 }
 0x139   : > { %p959_p7 = pnand %p958_p4, %p1067_p5 }
 0x13a   : > { %p964_p11 = por %p963_p10, %p962_p9 }
 0x13b   : > { %p960_p8 = pneg %p959_p7 }
 0x13c   : > { %p966_p13 = por %p965_p12, %p964_p11 }
 0x13e   : > { %p967_p0 = pnand %p966_p13, %p960_p8 }
 0x140   : > { %970 = shalt.err (!%p967_p0)
}
 0x141   : > { %902 = dma.vmem_to_hbm [thread:$0]  (%p1067_p5), %s1240_s10, 512, %s1238_s19, %s586_s16  }
 0x142 PF: > { %p908_p1 = scmp.ge.s32.totalorder %s1005_s15, 2  ;;  %s612_s6 = sand.u32 1, %s993_s12  }
 0x143   : > { %s613_s7 = scalar_lea.sflag [#allocation3], %s612_s6 }
 0x144   : > { %p905_p2 = pnand %p908_p1, %p1071_p6 }
 0x146   : > { %988 = dma.done.wait (!%p905_p2), %s613_s7, 512  }
 0x147   : > { %990 = vsyncadd (!%p905_p2), %s613_s7, 4294966784  ;;  %p13_p3 = scmp.ge.s32.totalorder %s1054_s18, 4   ;;  %s1288_s12 = smov %s997_s13 }
 0x148   : > { %s1289_s13 = smov %s1001_s14  ;;  %s1290_s14 = smov %s1065_s21 }
 0x149   : > { %s1291_s15 = smov %s1054_s18  ;;  %15 = sbr.rel (!%p13_p3) target bundleno = 3 (0x3), region = 67 }
 0x150   :  { %618 = vsyncpa [#allocation3], 1 }
 0x151   :  { %620 = vsyncpa [#allocation3 + $0x1], 1 }

</bundles_post_ra>
